<compile_context>
chip_gen: v7x
topology: tpu7x:2x2x1
jax: 0.10.0
libtpu: 0.0.40
codegen_flags: <defaults>
</compile_context>

<pallas_src>
import jax
import jax.numpy as jnp
from jax.experimental import pallas as pl
from jax.experimental.pallas import tpu as pltpu


def _round_up(v, m):
    return -(-v // m) * m


_VMEM_BUDGET = 24 << 20   # target for the double-buffered working set (all gens)
_VMEM_LIMIT = 48 << 20    # scoped VMEM limit: safe under v7x's 64 MiB physical


# ---------------------------------------------------------------------------
# Path A: in_dim == 1, out_dim == 1 — lane-dense scalar affine.
# ---------------------------------------------------------------------------
def _affine_lane_kernel(x_ref, w_ref, b_ref, o_ref):
    # x: (rows_tile, 128) slab; w, b: SMEM scalars.
    o_ref[...] = x_ref[...] * w_ref[0] + b_ref[0]


def _linear_scalar_lane_dense(x, weight, bias, *, rows_tile=256):
    n = x.shape[0]
    rows = _round_up(pl.cdiv(n, 128), 8)          # lane-dense slab height
    rows_tile = min(rows_tile, rows)              # both multiples of 8
    n_pad = rows * 128
    x_slab = jnp.pad(x.reshape(-1), (0, n_pad - n)).reshape(rows, 128)
    w_s = weight.reshape(1)
    b_s = bias.reshape(1)
    out = pl.pallas_call(
        _affine_lane_kernel,
        out_shape=jax.ShapeDtypeStruct((rows, 128), jnp.float32),
        grid=(pl.cdiv(rows, rows_tile),),
        in_specs=[
            pl.BlockSpec((rows_tile, 128), lambda i: (i, 0)),
            pl.BlockSpec(memory_space=pltpu.MemorySpace.SMEM),
            pl.BlockSpec(memory_space=pltpu.MemorySpace.SMEM),
        ],
        out_specs=pl.BlockSpec((rows_tile, 128), lambda i: (i, 0)),
        compiler_params=pltpu.CompilerParams(
            dimension_semantics=("parallel",)),
    )(x_slab, w_s, b_s)
    return out.reshape(-1)[:n].reshape(n, 1)


# ---------------------------------------------------------------------------
# Path B: in_dim == 1, out_dim > 1 — VPU broadcast FMA, pipelined over N.
# ---------------------------------------------------------------------------
def _bcast_fma_kernel(x_ref, wt_ref, b_ref, o_ref):
    # (rows_tile, 1) * (1, out_dim) + (1, out_dim) -> (rows_tile, out_dim)
    o_ref[...] = x_ref[...] * wt_ref[...] + b_ref[...]


def _linear_indim1(x, weight, bias, *, rows_tile=512):
    n = x.shape[0]
    out_dim = weight.shape[0]
    if out_dim == 1:
        return _linear_scalar_lane_dense(x, weight, bias)
    rows_tile = min(rows_tile, _round_up(n, 8))
    wt = weight.T                      # (1, out_dim)
    b2 = bias[None, :]                 # (1, out_dim)
    return pl.pallas_call(
        _bcast_fma_kernel,
        out_shape=jax.ShapeDtypeStruct((n, out_dim), jnp.float32),
        grid=(pl.cdiv(n, rows_tile),),
        in_specs=[
            pl.BlockSpec((rows_tile, 1), lambda i: (i, 0)),
            pl.BlockSpec((1, out_dim), lambda i: (0, 0)),
            pl.BlockSpec((1, out_dim), lambda i: (0, 0)),
        ],
        out_specs=pl.BlockSpec((rows_tile, out_dim), lambda i: (i, 0)),
        compiler_params=pltpu.CompilerParams(
            dimension_semantics=("parallel",)),
    )(x, wt, b2)


# ---------------------------------------------------------------------------
# General path: tiled GEMM + bias on the MXU (bf16 inputs, f32 accumulation).
# ---------------------------------------------------------------------------
def _linear_fullk_kernel(x_ref, wt_ref, b_ref, o_ref):
    # Full reduction in one block: no accumulator scratch, no k loop.
    o_ref[...] = jnp.dot(x_ref[...], wt_ref[...],
                         preferred_element_type=jnp.float32) + b_ref[...]


def _linear_ktiled_kernel(x_ref, wt_ref, b_ref, o_ref):
    # Accumulate directly into the resident f32 output block; initialize it
    # with the bias at k == 0 (no zero-init + epilogue add, no VMEM scratch).
    @pl.when(pl.program_id(2) == 0)
    def _():
        o_ref[...] = jnp.broadcast_to(b_ref[...], o_ref.shape)

    o_ref[...] += jnp.dot(x_ref[...], wt_ref[...],
                          preferred_element_type=jnp.float32)


def _linear_tiled(x, weight, bias, *, tm=512, tn=512, tk=512, use_bf16=True):
    n, in_dim = x.shape
    out_dim = weight.shape[0]

    in_dtype = jnp.bfloat16 if use_bf16 else jnp.float32
    bytes_in = 2 if use_bf16 else 4
    xc = x.astype(in_dtype)
    wt = weight.T.astype(in_dtype)            # (in_dim, out_dim)
    b2 = bias.astype(jnp.float32)[None, :]    # (1, out_dim)

    # Clamp tiles to the (aligned) problem; keep the N tile 256-aligned so the
    # 2x256^2 MXUs on v6e/v7x are fed full-width (v5e's 4x128^2 is fine too).
    tm = min(tm, _round_up(n, 8))
    tn = min(tn, _round_up(out_dim, 256 if out_dim > 128 else 128))

    # v7x has 2 TensorCores: make sure the parallel axes expose >= 2 blocks.
    if pl.cdiv(n, tm) * pl.cdiv(out_dim, tn) < 2:
        if n > 8:
            tm = max(8, _round_up(pl.cdiv(n, 2), 8))
        elif out_dim > 128:
            tn = max(128, _round_up(pl.cdiv(out_dim, 2), 128))

    cost = pl.CostEstimate(
        flops=2 * n * out_dim * in_dim,
        transcendentals=0,
        bytes_accessed=(n * in_dim + in_dim * out_dim) * bytes_in
        + (n * out_dim + out_dim) * 4,
    )

    # Full-K path: a block dim equal to the full array dim satisfies the
    # (8, 128) rule, so no host-side padding of X / W^T along K is needed.
    fullk_bytes = 2 * in_dim * (tm + tn) * bytes_in + 2 * tm * tn * 4
    if fullk_bytes <= _VMEM_BUDGET:
        grid = (pl.cdiv(n, tm), pl.cdiv(out_dim, tn))
        return pl.pallas_call(
            _linear_fullk_kernel,
            out_shape=jax.ShapeDtypeStruct((n, out_dim), jnp.float32),
            grid=grid,
            in_specs=[
                pl.BlockSpec((tm, in_dim), lambda i, j: (i, 0)),
                pl.BlockSpec((in_dim, tn), lambda i, j: (0, j)),
                pl.BlockSpec((1, tn), lambda i, j: (0, j)),
            ],
            out_specs=pl.BlockSpec((tm, tn), lambda i, j: (i, j)),
            compiler_params=pltpu.CompilerParams(
                dimension_semantics=("parallel", "parallel"),
                vmem_limit_bytes=_VMEM_LIMIT),
            cost_estimate=cost,
        )(xc, wt, b2)

    # K-tiled fallback (large in_dim): zero-pad X / W^T along K so the partial
    # reduction stays exact; N / out_dim boundaries rely on masked stores only.
    tk = min(tk, _round_up(in_dim, 256))
    kp = _round_up(in_dim, tk)
    if kp != in_dim:
        xc = jnp.pad(xc, ((0, 0), (0, kp - in_dim)))
        wt = jnp.pad(wt, ((0, kp - in_dim), (0, 0)))
    grid = (pl.cdiv(n, tm), pl.cdiv(out_dim, tn), kp // tk)
    return pl.pallas_call(
        _linear_ktiled_kernel,
        out_shape=jax.ShapeDtypeStruct((n, out_dim), jnp.float32),
        grid=grid,
        in_specs=[
            pl.BlockSpec((tm, tk), lambda i, j, k: (i, k)),
            pl.BlockSpec((tk, tn), lambda i, j, k: (k, j)),
            pl.BlockSpec((1, tn), lambda i, j, k: (0, j)),
        ],
        out_specs=pl.BlockSpec((tm, tn), lambda i, j, k: (i, j)),
        compiler_params=pltpu.CompilerParams(
            dimension_semantics=("parallel", "parallel", "arbitrary"),
            vmem_limit_bytes=_VMEM_LIMIT),
        cost_estimate=cost,
    )(xc, wt, b2)


def linear_forward(x, weight, bias, *, tm=512, tn=512, tk=512, use_bf16=True):
    """nn.Linear forward: x (N, in_dim) @ weight (out_dim, in_dim)^T + bias."""
    x = x.astype(jnp.float32)
    weight = weight.astype(jnp.float32)
    bias = bias.astype(jnp.float32)
    in_dim = x.shape[1]
    if in_dim == 1:
        # Never fall through to the MXU path here: it would pad K 1 -> 128
        # (128x extra HBM reads of X and >99% zero MXU work).
        return _linear_indim1(x, weight, bias)
    return _linear_tiled(x, weight, bias, tm=tm, tn=tn, tk=tk,
                         use_bf16=use_bf16)


if __name__ == "__main__":
    key = jax.random.PRNGKey(0)

    # ---- Case 1: faithful to the PyTorch script: LinearRegression(1, 1) -----
    input_dim, output_dim = 1, 1
    kw, kb, key = jax.random.split(key, 3)
    bound = 1.0 / (input_dim ** 0.5)
    weight = jax.random.uniform(kw, (output_dim, input_dim),
                                minval=-bound, maxval=bound, dtype=jnp.float32)
    bias = jax.random.uniform(kb, (output_dim,),
                              minval=-bound, maxval=bound, dtype=jnp.float32)
    X = jnp.array([[1.0], [2.0], [3.0], [4.0]], dtype=jnp.float32)

    y = linear_forward(X, weight, bias)
    jax.block_until_ready(y)
    y_ref = X @ weight.T + bias
    assert y.shape == (4, 1) and y.dtype == jnp.float32
    assert jnp.allclose(y, y_ref, atol=1e-5, rtol=1e-5)

    # ---- Case 2: in_dim == 1, out_dim > 1 (broadcast-FMA path over N) -------
    n1, od1 = 300, 64
    k1, k2, k3, key = jax.random.split(key, 4)
    x1 = jax.random.normal(k1, (n1, 1), dtype=jnp.float32)
    w1 = jax.random.uniform(k2, (od1, 1), minval=-1.0, maxval=1.0,
                            dtype=jnp.float32)
    b1 = jax.random.uniform(k3, (od1,), minval=-1.0, maxval=1.0,
                            dtype=jnp.float32)
    y1 = linear_forward(x1, w1, b1)
    jax.block_until_ready(y1)
    assert y1.shape == (n1, od1) and y1.dtype == jnp.float32
    assert jnp.allclose(y1, x1 @ w1.T + b1, atol=1e-5, rtol=1e-5)

    # ---- Case 3: general tiled MXU path (bf16 in, f32 acc), unaligned N_out -
    n2, ind2, od2 = 256, 192, 320
    k4, k5, k6 = jax.random.split(key, 3)
    x2 = jax.random.normal(k4, (n2, ind2), dtype=jnp.float32)
    bound = 1.0 / (ind2 ** 0.5)
    w2 = jax.random.uniform(k5, (od2, ind2), minval=-bound, maxval=bound,
                            dtype=jnp.float32)
    b2 = jax.random.uniform(k6, (od2,), minval=-bound, maxval=bound,
                            dtype=jnp.float32)
    y2 = linear_forward(x2, w2, b2)
    jax.block_until_ready(y2)
    assert y2.shape == (n2, od2) and y2.dtype == jnp.float32
    # Tight check vs. a reference built from the same bf16-quantized inputs.
    y2_q = (x2.astype(jnp.bfloat16).astype(jnp.float32)
            @ w2.T.astype(jnp.bfloat16).astype(jnp.float32)) + b2
    assert jnp.allclose(y2, y2_q, atol=1e-4, rtol=1e-4)
    # Loose check vs. the full-f32 reference (bf16 input quantization error).
    assert jnp.allclose(y2, x2 @ w2.T + b2, atol=3e-2, rtol=3e-2)

    print("KERNEL_OK")
</pallas_src>

<mosaic_0001>
module attributes {stable_mosaic.version = 11 : i64} {
  func.func @_affine_lane_kernel(%arg0: i32, %arg1: memref<8x128xf32, #tpu.memory_space<vmem>>, %arg2: memref<1xf32, #tpu.memory_space<smem>>, %arg3: memref<1xf32, #tpu.memory_space<smem>>, %arg4: memref<8x128xf32, #tpu.memory_space<vmem>>) attributes {dimension_semantics = [#tpu.dimension_semantics<parallel>], iteration_bounds = array<i64: 1>, scalar_prefetch = 0 : i64, scratch_operands = 0 : i64, tpu.core_type = #tpu.core_type<tc>, window_params = [{transform_indices = @transform_0, window_bounds = array<i64: 8, 128>}, {transform_indices = @transform_1, window_bounds = array<i64: 1>}, {transform_indices = @transform_2, window_bounds = array<i64: 1>}, {transform_indices = @transform_3, window_bounds = array<i64: 8, 128>}]} {
    %c0 = arith.constant 0 : index
    %c0_0 = arith.constant 0 : index
    %0 = vector.load %arg1[%c0, %c0_0] : memref<8x128xf32, #tpu.memory_space<vmem>>, vector<8x128xf32>
    %c0_1 = arith.constant 0 : index
    %1 = memref.load %arg2[%c0_1] : memref<1xf32, #tpu.memory_space<smem>>
    %2 = vector.broadcast %1 : f32 to vector<8x128xf32>
    %3 = arith.mulf %0, %2 : vector<8x128xf32>
    %c0_2 = arith.constant 0 : index
    %4 = memref.load %arg3[%c0_2] : memref<1xf32, #tpu.memory_space<smem>>
    %5 = vector.broadcast %4 : f32 to vector<8x128xf32>
    %6 = arith.addf %3, %5 : vector<8x128xf32>
    %c0_3 = arith.constant 0 : index
    %c0_4 = arith.constant 0 : index
    %7 = vector.load %arg4[%c0_3, %c0_4] : memref<8x128xf32, #tpu.memory_space<vmem>>, vector<8x128xf32>
    tpu.vector_store %arg4[%c0_3, %c0_4], %6 {strides = array<i32>} : memref<8x128xf32, #tpu.memory_space<vmem>>, vector<8x128xf32>,
    return
  }
  func.func @transform_0(%arg0: i32) -> (i32, i32) {
    %c0_i32 = arith.constant 0 : i32
    %c0_i32_0 = arith.constant 0 : i32
    return %arg0, %c0_i32 : i32, i32
  }
  func.func @transform_1(%arg0: i32) -> i32 {
    %c0_i32 = arith.constant 0 : i32
    %c0_i32_0 = arith.constant 0 : i32
    return %c0_i32 : i32
  }
  func.func @transform_2(%arg0: i32) -> i32 {
    %c0_i32 = arith.constant 0 : i32
    %c0_i32_0 = arith.constant 0 : i32
    return %c0_i32 : i32
  }
  func.func @transform_3(%arg0: i32) -> (i32, i32) {
    %c0_i32 = arith.constant 0 : i32
    %c0_i32_0 = arith.constant 0 : i32
    return %arg0, %c0_i32 : i32, i32
  }
}

</mosaic_0001>

<bundles_post_ra>
// kernel: tpu_custom_call.1
= control target key start
LH: loop header
LB: loop body
LE: loop exit
PB: predicated region body
PF: predicated region fallthrough
CT: control target
= control target key end

     0   :  { %10 = vsyncpa [#allocation5], 0  ;;  %s154_s0 = inlined_call_operand.hbm [shape: f32[8,128], index: 0, kind: input, shape index: {}]   ;;  %s155_s1 = inlined_call_operand.<no memory space> [shape: f32[1], index: 1, kind: input, shape index: {}]   ;;  %s156_s2 = inlined_call_operand.<no memory space> [shape: f32[1], index: 2, kind: input, shape index: {}]   ;;  %s157_s3 = inlined_call_operand.hbm [shape: f32[8,128], index: 3, kind: output, shape index: {}]  }
   0x1   :  { %11 = vsyncpa [#allocation6], 0  ;;  %s102_s12 = smov [#allocation4]   ;;  %s54_s16 = scalar_lea.hbm %s154_s0, 128 }
   0x2   :  { %s18_s13 = sshll.u32 %s102_s12, 4  ;;  %p55_p0 = scmp.ne.s32.totalorder %s154_s0, %s54_s16  ;;  %s19_s13 = int_to_ptr.vmem [resolvable:$true] %s18_s13 }
   0x3   :  { %p58_p1 = scmp.lt.u32.totalorder %s54_s16, %s154_s0 }
   0x5   :  { %p60_p2 = pnand %p58_p1, %p55_p0 }
   0x7   :  { %63 = shalt.err (!%p60_p2)
}
   0x8   :  { %s64_s21 = scalar_lea.vmem %s19_s13, 128  ;;  %p69_p4 = scmp.lt.s32.totalorder %s19_s13, %s19_s13 }
   0x9   :  { %p65_p3 = scmp.ne.s32.totalorder %s19_s13, %s64_s21  ;;  %p70_p5 = scmp.lt.s32.totalorder %s64_s21, %s64_s21 }
   0xb   :  { %p71_p6 = por %p70_p5, %p69_p4 }
   0xd   :  { %p72_p7 = pnand %p71_p6, %p65_p3 }
   0xf   :  { %75 = shalt.err (!%p72_p7)
}
  0x10   :  { %21 = dma.hbm_to_vmem [thread:$0]  %s154_s0, 128, %s19_s13, [#allocation5]  }
  0x11   :  { %98 = dma.done.wait [#allocation5], 128  }
  0x12   :  { %99 = vsyncadd [#allocation5], 4294967168  ;;  %v31_v0 = vstv %s155_s1  ;;  %v29_v1 = vld [vmem:[#allocation4] sm:$0xff]  ;;  %v34_v2 = vstv %s156_s2  ;;  %s103_s28 = smov [#allocation7]  }
  0x13   :  { %s43_s29 = sshll.u32 %s103_s28, 4  ;;  %v32_v3 = vmul.f32 %v31_v0, %v29_v1  ;;  %s44_s29 = int_to_ptr.vmem [resolvable:$true] %s43_s29 }
  0x14   :  { %s76_s30 = scalar_lea.vmem %s44_s29, 128  ;;  %p81_p9 = scmp.lt.s32.totalorder %s44_s29, %s44_s29 }
  0x15   :  { %v35_v4 = vadd.f32 %v34_v2, %v32_v3  ;;  %p77_p8 = scmp.ne.s32.totalorder %s44_s29, %s76_s30  ;;  %p82_p10 = scmp.lt.s32.totalorder %s76_s30, %s76_s30 }
  0x17   :  { %36 = vst [vmem:[#allocation7] sm:$0xff] %v35_v4  ;;  %p83_p11 = por %p82_p10, %p81_p9 }
  0x19   :  { %p84_p12 = pnand %p83_p11, %p77_p8 }
  0x1b   :  { %87 = shalt.err (!%p84_p12)
}
  0x1c   :  { %s88_s4 = scalar_lea.hbm %s157_s3, 128 }
  0x1d   :  { %p89_p13 = scmp.ne.s32.totalorder %s157_s3, %s88_s4  ;;  %p92_p0 = scmp.lt.u32.totalorder %s88_s4, %s157_s3 }
  0x1f   :  { %p94_p1 = pnand %p92_p0, %p89_p13 }
  0x21   :  { %97 = shalt.err (!%p94_p1)
}
  0x22   :  { %46 = dma.vmem_to_hbm [thread:$0]  %s44_s29, 128, %s157_s3, [#allocation6]  }
  0x23   :  { %100 = dma.done.wait [#allocation6], 128  }
  0x24   :  { %101 = vsyncadd [#allocation6], 4294967168 }
  0x25   :  { %50 = vsyncpa [#allocation5], 1 }
  0x26   :  { %51 = vsyncpa [#allocation6], 1 }

</bundles_post_ra>
